<compile_context>
chip_gen: v6e
topology: v6e:2x2x1
jax: 0.10.0
libtpu: 0.0.40
codegen_flags: <defaults>
</compile_context>

<pallas_src>
import jax
import jax.numpy as jnp
from jax.experimental import pallas as pl
from jax.experimental.pallas import tpu as pltpu


# --------------------------------------------------------------------------
# Stage 1: F_abs = L1-column-normalized |F|   (tiled over n_samples)
# --------------------------------------------------------------------------
def _fnorm_kernel(f_ref, fabs_ref):
    f_abs = jnp.abs(f_ref[...])
    col_sum = jnp.sum(f_abs, axis=0, keepdims=True)          # (1, tn)
    # exact reciprocal keeps bit-closeness to torch normalize(p=1, eps=1e-12)
    fabs_ref[...] = f_abs * pl.reciprocal(jnp.maximum(col_sum, 1e-12),
                                          approx=False)


# --------------------------------------------------------------------------
# Stage 2: B = |C| @ F_abs, also emits |C|   (tiled over n_features x n_samples)
# --------------------------------------------------------------------------
def _matmul_kernel(c_ref, fabs_ref, b_ref, cabs_ref):
    c_abs = jnp.abs(c_ref[...])                               # (tm, nc) - cheap

    # C_abs block index depends only on the row axis; write it once per row
    # tile (it stays VMEM-resident across the inner sample axis).
    @pl.when(pl.program_id(1) == 0)
    def _():
        cabs_ref[...] = c_abs

    b_ref[...] = jnp.dot(c_abs, fabs_ref[...],
                         preferred_element_type=jnp.float32)


def nnd_forward(C, F, *, tm=512, tn=1024):
    """NND forward. C: (nf, nc), F: (nc, ns). Returns (B_prd, F_abs, C_abs)."""
    nf, nc = C.shape
    nc2, ns = F.shape
    assert nc == nc2

    # Clamp tiles: either a (8,128)-friendly tile or the full extent.
    tm = min(tm, nf)
    tn = min(tn, ns)

    vmem_params = dict(vmem_limit_bytes=32 * 1024 * 1024)

    # ---- Stage 1: normalized |F| ------------------------------------------
    f_abs = pl.pallas_call(
        _fnorm_kernel,
        out_shape=jax.ShapeDtypeStruct((nc, ns), jnp.float32),
        grid=(pl.cdiv(ns, tn),),
        in_specs=[pl.BlockSpec((nc, tn), lambda j: (0, j))],
        out_specs=pl.BlockSpec((nc, tn), lambda j: (0, j)),
        compiler_params=pltpu.CompilerParams(
            dimension_semantics=("parallel",), **vmem_params),
    )(F)

    # ---- Stage 2: tiled matmul + |C| --------------------------------------
    b_prd, c_abs = pl.pallas_call(
        _matmul_kernel,
        out_shape=(
            jax.ShapeDtypeStruct((nf, ns), jnp.float32),      # B_prd
            jax.ShapeDtypeStruct((nf, nc), jnp.float32),      # C_abs
        ),
        grid=(pl.cdiv(nf, tm), pl.cdiv(ns, tn)),              # (rows, samples)
        in_specs=[
            pl.BlockSpec((tm, nc), lambda i, j: (i, 0)),      # C row tile
            pl.BlockSpec((nc, tn), lambda i, j: (0, j)),      # F_abs col tile
        ],
        out_specs=(
            pl.BlockSpec((tm, tn), lambda i, j: (i, j)),      # B tile
            pl.BlockSpec((tm, nc), lambda i, j: (i, 0)),      # C_abs row tile
        ),
        compiler_params=pltpu.CompilerParams(
            # rows parallel (megacore on v7x); sample axis arbitrary because
            # the C_abs output block is resident across it.
            dimension_semantics=("parallel", "arbitrary"), **vmem_params),
    )(C, f_abs)

    return b_prd, f_abs, c_abs


# --------------------------------------------------------------------------
# Self-test
# --------------------------------------------------------------------------
def _reference(C, F):
    f_abs = jnp.abs(F)
    f_norm = f_abs / jnp.maximum(jnp.sum(f_abs, axis=0, keepdims=True), 1e-12)
    c_abs = jnp.abs(C)
    return c_abs @ f_norm, f_norm, c_abs


def _check(C, F, **kw):
    B_prd, F_abs, C_abs = jax.block_until_ready(nnd_forward(C, F, **kw))
    B_ref, F_ref, C_ref = _reference(C, F)
    assert jnp.allclose(B_prd, B_ref, atol=1e-5, rtol=1e-5)
    assert jnp.allclose(F_abs, F_ref, atol=1e-6, rtol=1e-6)
    assert jnp.allclose(C_abs, C_ref, atol=1e-6, rtol=1e-6)


if __name__ == "__main__":
    # (1) Tiled path: exercises a 2x2 grid with lane-dense 256-wide tiles.
    n_features, n_samples, n_components = 256, 512, 16
    kc, kf = jax.random.split(jax.random.PRNGKey(0))
    C = jax.random.uniform(kc, (n_features, n_components), dtype=jnp.float32)
    F = jax.random.uniform(kf, (n_components, n_samples), dtype=jnp.float32)
    _check(C, F, tm=128, tn=256)

    # (2) Tiny-shape path (full-extent blocks), matching the original module's
    #     toy sizes — everything collapses to a single block per kernel.
    n_features, n_samples, n_components = 32, 16, 8
    kc, kf = jax.random.split(jax.random.PRNGKey(1))
    C2 = jax.random.uniform(kc, (n_features, n_components), dtype=jnp.float32)
    F2 = jax.random.uniform(kf, (n_components, n_samples), dtype=jnp.float32)
    _check(C2, F2)

    print("KERNEL_OK")
</pallas_src>

<mosaic_0001>
module attributes {stable_mosaic.version = 11 : i64} {
  func.func @_fnorm_kernel(%arg0: i32, %arg1: memref<16x256xf32, #tpu.memory_space<vmem>>, %arg2: memref<16x256xf32, #tpu.memory_space<vmem>>) attributes {dimension_semantics = [#tpu.dimension_semantics<parallel>], iteration_bounds = array<i64: 2>, scalar_prefetch = 0 : i64, scratch_operands = 0 : i64, tpu.core_type = #tpu.core_type<tc>, window_params = [{transform_indices = @transform_0, window_bounds = array<i64: 16, 256>}, {transform_indices = @transform_1, window_bounds = array<i64: 16, 256>}]} {
    %c0 = arith.constant 0 : index
    %c0_0 = arith.constant 0 : index
    %0 = vector.load %arg1[%c0, %c0_0] : memref<16x256xf32, #tpu.memory_space<vmem>>, vector<16x256xf32>
    %1 = math.absf %0 : vector<16x256xf32>
    %cst = arith.constant dense<0.000000e+00> : vector<256xf32>
    %2 = vector.multi_reduction <add>, %1, %cst [0] : vector<16x256xf32> to vector<256xf32>
    %3 = vector.shape_cast %2 : vector<256xf32> to vector<1x256xf32>
    %cst_1 = arith.constant 9.99999996E-13 : f32
    %4 = vector.broadcast %cst_1 : f32 to vector<1x256xf32>
    %5 = arith.maximumf %3, %4 : vector<1x256xf32>
    %6 = tpu.reciprocal %5 : vector<1x256xf32> -> vector<1x256xf32>
    %7 = vector.broadcast %6 : vector<1x256xf32> to vector<16x256xf32>
    %8 = arith.mulf %1, %7 : vector<16x256xf32>
    %c0_2 = arith.constant 0 : index
    %c0_3 = arith.constant 0 : index
    %9 = vector.load %arg2[%c0_2, %c0_3] : memref<16x256xf32, #tpu.memory_space<vmem>>, vector<16x256xf32>
    tpu.vector_store %arg2[%c0_2, %c0_3], %8 {strides = array<i32>} : memref<16x256xf32, #tpu.memory_space<vmem>>, vector<16x256xf32>,
    return
  }
  func.func @transform_0(%arg0: i32) -> (i32, i32) {
    %c0_i32 = arith.constant 0 : i32
    %c0_i32_0 = arith.constant 0 : i32
    return %c0_i32, %arg0 : i32, i32
  }
  func.func @transform_1(%arg0: i32) -> (i32, i32) {
    %c0_i32 = arith.constant 0 : i32
    %c0_i32_0 = arith.constant 0 : i32
    return %c0_i32, %arg0 : i32, i32
  }
}

</mosaic_0001>

<bundles_post_ra>
// kernel: tpu_custom_call.1
= control target key start
LH: loop header
LB: loop body
LE: loop exit
PB: predicated region body
PF: predicated region fallthrough
CT: control target
= control target key end

     0   :  { %6 = vsyncpa [#allocation3], 0  ;;  %s602_s0 = inlined_call_operand.hbm [shape: f32[16,512], index: 0, kind: input, shape index: {}]   ;;  %s603_s1 = inlined_call_operand.hbm [shape: f32[16,512], index: 1, kind: output, shape index: {}]  }
   0x1   :  { %8 = vsyncpa [#allocation3 + $0x1], 0 }
   0x2   :  { %9 = vsyncpa [#allocation4], 0 }
   0x3   :  { %11 = vsyncpa [#allocation4 + $0x1], 0  ;;  %s442_s6 = smov 0   ;;  %s444_s7 = smov 0  }
   0x4   :  { %s446_s8 = smov 0   ;;  %s448_s9 = smov 0  }
   0x5 LB: > { %s463_s10 = sadd.s32 4294967295, %s422_s9   ;;  %s258_s11 = sadd.s32 4294967294, %s422_s9   ;;  %s422_s9 = sphi %s448_s9, %s619_s9   ;;  %s418_s8 = sphi %s446_s8, %s618_s8   ;;  %s414_s7 = sphi %s444_s7, %s617_s7   ;;  %s410_s6 = sphi %s442_s6, %s616_s6  }
   0x6   : > { %s467_s12 = sadd.s32 1, %s422_s9   ;;  %s24_s13 = sadd.s32 1, %s418_s8 }
   0x7   : > { %s21_s14 = ssub.s32 %s422_s9, %s467_s12  ;;  %p31_p0 = scmp.ne.s32.totalorder %s418_s8, %s414_s7 }
   0x8   : > { %p22_p1 = scmp.eq.s32.totalorder %s21_s14, 0  ;;  %p32_p2 = scmp.eq.s32.totalorder %s422_s9, 0 }
   0x9   : > { %p37_p3 = scmp.ne.s32.totalorder %s414_s7, %s410_s6  ;;  %p38_p4 = scmp.eq.s32.totalorder %s463_s10, 0 }
   0xa   : > { %s479_s15 = scalar_select %p22_p1, %s418_s8, %s24_s13  }
   0xb   : > { %p481_p5 = por %p32_p2, %p31_p0  ;;  %p485_p6 = por %p38_p4, %p37_p3 }
   0xc   : > { %p61_p7 = scmp.eq.s32.totalorder %s463_s10, 1  ;;  %p67_p8 = scmp.eq.s32.totalorder %s258_s11, 1 }
   0xd   : > { %s607_s17 = scalar_select %p485_p6, 1, 0 }
   0xe   : > { %p286_p10 = scmp.lt.s32.totalorder %s422_s9, 2  ;;  %p492_p11 = por %p61_p7, %p31_p0 }
   0xf   : > { %p496_p12 = por %p67_p8, %p37_p3  ;;  %s87_s20 = sand.u32 1, %s418_s8  }
  0x10   : > { %s608_s18 = scalar_select %p492_p11, 1, 0 }
  0x11   : > { %s609_s19 = scalar_select %p496_p12, 1, 0 }
  0x12   : > { %s272_s21 = sshll.u32 %s422_s9, 8  ;;  %s261_s22 = sshll.u32 %s87_s20, 5 }
  0x13   : > { %s505_s25 = scalar_lea.hbm %s602_s0, %s272_s21  ;;  %s91_s26 = scalar_lea.vmem [#allocation2], %s261_s22 }
  0x14   : > { %s98_s27 = sshll.u32 %s91_s26, 4  ;;  %p509_p13 = pnand %p286_p10, %p481_p5  ;;  %s513_s27 = int_to_ptr.vmem [resolvable:$true] %s98_s27 }
  0x15   : > { %s516_s29 = scalar_lea.sflag [#allocation3], %s87_s20  ;;  %s330_s30 = scalar_lea.hbm %s505_s25, 512 }
  0x16   : > { %p331_p1 = scmp.ne.s32.totalorder %s505_s25, %s330_s30  ;;  %p332_p2 = pneg %p509_p13 }
  0x17   : > { %s335_s4 = scalar_lea.hbm %s602_s0, 1024  ;;  %p336_p5 = scmp.lt.s32.totalorder %s505_s25, %s602_s0 }
  0x18   : > { %p333_p3 = pnand %p332_p2, %p331_p1  ;;  %p337_p7 = scmp.lt.s32.totalorder %s335_s4, %s330_s30 }
  0x1a   : > { %p334_p4 = pneg %p333_p3  ;;  %p338_p8 = por %p337_p7, %p336_p5 }
  0x1c   : > { %p339_p10 = pnand %p338_p8, %p334_p4 }
  0x1e   : > { %342 = shalt.err (!%p339_p10)
}
  0x1f   : > { %s343_s13 = scalar_lea.vmem %s513_s27, 512  ;;  %s424_s14 = smov [#allocation2]  }
  0x20   : > { %p344_p9 = scmp.ne.s32.totalorder %s513_s27, %s343_s13  ;;  %s348_s16 = sshll.u32 %s424_s14, 4  ;;  %s349_s16 = int_to_ptr.vmem [resolvable:$false] %s348_s16 }
  0x21   : > { %s350_s20 = scalar_lea.vmem %s349_s16, 1024  ;;  %p351_p3 = scmp.lt.s32.totalorder %s513_s27, %s349_s16 }
  0x22   : > { %p346_p0 = pnand %p344_p9, %p332_p2  ;;  %p352_p12 = scmp.lt.s32.totalorder %s350_s20, %s343_s13 }
  0x24   : > { %p347_p1 = pneg %p346_p0  ;;  %p353_p11 = por %p352_p12, %p351_p3 }
  0x26   : > { %p354_p6 = pnand %p353_p11, %p347_p1 }
  0x28   : > { %357 = shalt.err (!%p354_p6)
}
  0x29   : > { %s425_s21 = smov 512   ;;  %s426_s22 = smov 256  }
  0x2a   : > { %s427_s23 = smov 16   ;;  %p106_p9 = scmp.lt.s32.totalorder %s422_s9, 3 }
  0x2b   : > { %281 = dma.hbm_to_vmem [thread:$0]  (!%p509_p13), %s505_s25, 512, %s513_s27, %s516_s29, %s425_s21, %s426_s22, %s427_s23  }
  0x2c   : > { %p611_p0 = scmp.ge.s32.totalorder %s422_s9, 1 }
  0x2e   : > { %p107_p2 = pnand %p611_p0, %p106_p9 }
  0x2f   : > { %s541_s24 = sand.u32 (!%p107_p2), 1, %s414_s7   ;;  %p612_p6 = scmp.ne.s32.totalorder (!%p107_p2), %s607_s17, 0 }
  0x30   : > { %110 = sbr.rel (%p107_p2) target bundleno = 105 (0x69), region = 24  ;;  %s265_s26 = sshll.u32 (!%p107_p2), %s541_s24, 5 }
  0x31   : > { %s113_s30 = scalar_lea.sflag (!%p107_p2), [#allocation3], %s541_s24  ;;  %s116_s2 = scalar_lea.vmem (!%p107_p2), [#allocation2], %s265_s26 }
  0x35   : > { %401 = dma.done.wait (%p612_p6), %s113_s30, 512  }
  0x36   : > { %403 = vsyncadd (%p612_p6), %s113_s30, 4294966784  ;;  %v137_v0 = vld [vmem:[%s116_s2] sm:$0xff]  ;;  %v139_v1 = vld [vmem:[%s116_s2 + $0x10] sm:$0xff]  ;;  %s134_s17 = scalar_lea.vmem [#allocation5], %s265_s26  ;;  %s273_s27 = sshll.u32 %s463_s10, 8 }
  0x37   : > { %v138_v2 = vld [vmem:[%s116_s2 + $0x8] sm:$0xff]  ;;  %v141_v3 = vand.u32 2147483647, %v137_v0  ;;  %v143_v4 = vand.u32 2147483647, %v139_v1  ;;  %v140_v5 = vld [vmem:[%s116_s2 + $0x18] sm:$0xff]  ;;  %s559_s3 = scalar_lea.hbm %s603_s1, %s273_s27 }
  0x38   : > { %v142_v6 = vand.u32 2147483647, %v138_v2  ;;  %v144_v7 = vand.u32 2147483647, %v140_v5  ;;  %s185_s25 = sshll.u32 %s134_s17, 4  ;;  %s172_s10 = scalar_lea.sflag [#allocation4], %s541_s24  ;;  %s554_s25 = int_to_ptr.vmem [resolvable:$true] %s185_s25 }
  0x39   : > { %v145_v8 = vadd.f32 %v143_v4, %v141_v3  ;;  %s358_s4 = scalar_lea.vmem %s554_s25, 512  ;;  %p613_p12 = scmp.ne.s32.totalorder %s608_s18, 0 }
  0x3a   : > { %v152_v9 = vadd.f32 %v144_v7, %v142_v6  ;;  %p359_p11 = scmp.ne.s32.totalorder %s554_s25, %s358_s4  ;;  %s428_s5 = smov [#allocation5]  }
  0x3b   : > { %v146_v10 = vrot.slane %v145_v8, 4  ;;  %s362_s11 = sshll.u32 %s428_s5, 4  ;;  %s363_s11 = int_to_ptr.vmem [resolvable:$false] %s362_s11 }
  0x3c   : > { %v153_v11 = vrot.slane %v152_v9, 4  ;;  %p360_p13 = pnand %p359_p11, %p613_p12  ;;  %s364_s13 = scalar_lea.vmem %s363_s11, 1024 }
  0x3d   : > { %v147_v12 = vadd.f32 %v146_v10, %v145_v8  ;;  %p365_p5 = scmp.lt.s32.totalorder %s554_s25, %s363_s11  ;;  %p366_p7 = scmp.lt.s32.totalorder %s364_s13, %s358_s4 }
  0x3e   : > { %v154_v13 = vadd.f32 %v153_v11, %v152_v9  ;;  %p361_p4 = pneg %p360_p13 }
  0x3f   : > { %v148_v14 = vrot.slane %v147_v12, 2  ;;  %p367_p8 = por %p366_p7, %p365_p5 }
  0x40   : > { %v155_v15 = vrot.slane %v154_v13, 2 }
  0x41   : > { %v149_v16 = vadd.f32 %v148_v14, %v147_v12  ;;  %p368_p10 = pnand %p367_p8, %p361_p4 }
  0x42   : > { %v156_v17 = vadd.f32 %v155_v15, %v154_v13 }
  0x43   : > { %v150_v18 = vrot.slane %v149_v16, 1 }
  0x44   : > { %v157_v19 = vrot.slane %v156_v17, 1 }
  0x45   : > { %v151_v20 = vadd.f32 %v150_v18, %v149_v16 }
  0x46   : > { %v158_v21 = vadd.f32 %v157_v19, %v156_v17 }
  0x47   : > { %v159_v22 = vmax.f32 %v151_v20, 1e-12 }
  0x48   : > { %v160_v23 = vmax.f32 %v158_v21, 1e-12 }
  0x49   : > { %326 = vrcp.f32 %v159_v22 }
  0x4a   : > { %328 = vrcp.f32 %v160_v23 }
  0x56   : > { %v327_v24 = vpop.eup %326 }
  0x57   : > { %v329_v25 = vpop.eup %328  ;;  %v163_v26 = vmul.f32 %v327_v24, %v141_v3  ;;  %v165_v27 = vmul.f32 %v327_v24, %v143_v4 }
  0x58   : > { %v164_v28 = vmul.f32 %v329_v25, %v142_v6  ;;  %v166_v29 = vmul.f32 %v329_v25, %v144_v7 }
  0x59   : > { %167 = vst [vmem:[%s134_s17] sm:$0xff] %v163_v26  ;;  %169 = vst [vmem:[%s134_s17 + $0x10] sm:$0xff] %v165_v27 }
  0x5a   : > { %168 = vst [vmem:[%s134_s17 + $0x8] sm:$0xff] %v164_v28  ;;  %170 = vst [vmem:[%s134_s17 + $0x18] sm:$0xff] %v166_v29 }
  0x5b   : > { %371 = shalt.err (!%p368_p10)
}
  0x5c   : > { %s372_s14 = scalar_lea.hbm %s559_s3, 512  ;;  %s376_s21 = scalar_lea.hbm %s603_s1, 1024 }
  0x5d   : > { %p373_p1 = scmp.ne.s32.totalorder %s559_s3, %s372_s14  ;;  %p377_p0 = scmp.lt.s32.totalorder %s559_s3, %s603_s1 }
  0x5e   : > { %p378_p2 = scmp.lt.s32.totalorder %s376_s21, %s372_s14 }
  0x5f   : > { %p374_p3 = pnand %p373_p1, %p613_p12 }
  0x60   : > { %p379_p6 = por %p378_p2, %p377_p0 }
  0x61   : > { %p375_p9 = pneg %p374_p3 }
  0x63   : > { %p380_p11 = pnand %p379_p6, %p375_p9 }
  0x65   : > { %383 = shalt.err (!%p380_p11)
}
  0x66   : > { %s429_s26 = smov 256   ;;  %s430_s30 = smov 512  }
  0x67   : > { %s431_s2 = smov 16  }
  0x68   : > { %276 = dma.vmem_to_hbm [thread:$0]  (%p613_p12), %s554_s25, 512, %s559_s3, %s172_s10, %s429_s26, %s430_s30, %s431_s2  }
  0x69 PF: > { %s200_s17 = sand.u32 1, %s410_s6   ;;  %p614_p13 = scmp.ne.s32.totalorder %s609_s19, 0 }
  0x6a   : > { %p615_p4 = scmp.ge.s32.totalorder %s422_s9, 2  ;;  %s201_s27 = scalar_lea.sflag [#allocation4], %s200_s17 }
  0x6c   : > { %p283_p5 = pnand %p615_p4, %p614_p13 }
  0x6e   : > { %p284_p7 = pneg %p283_p5 }
  0x70   : > { %405 = dma.done.wait (%p284_p7), %s201_s27, 512  }
  0x71   : > { %407 = vsyncadd (%p284_p7), %s201_s27, 4294966784  ;;  %p14_p8 = scmp.ge.s32.totalorder %s467_s12, 4   ;;  %s616_s6 = smov %s414_s7 }
  0x72   : > { %s617_s7 = smov %s418_s8  ;;  %s618_s8 = smov %s479_s15 }
  0x73   : > { %s619_s9 = smov %s467_s12  ;;  %16 = sbr.rel (!%p14_p8) target bundleno = 5 (0x5), region = 69 }
  0x78   :  { %206 = vsyncpa [#allocation3], 1 }
  0x79   :  { %208 = vsyncpa [#allocation3 + $0x1], 1 }
  0x7a   :  { %209 = vsyncpa [#allocation4], 1 }
  0x7b   :  { %211 = vsyncpa [#allocation4 + $0x1], 1 }

</bundles_post_ra>
